<compile_context>
chip_gen: v7x
topology: tpu7x:2x2x1
jax: 0.10.0
libtpu: 0.0.40
codegen_flags: <defaults>
</compile_context>

<pallas_src>
import jax
import jax.numpy as jnp
from jax import lax
from jax.experimental import pallas as pl
from jax.experimental.pallas import tpu as pltpu


def _round_up(n, m):
    return pl.cdiv(n, m) * m


def _mlp_kernel(x_ref, w1_ref, b1_ref, w2_ref, b2_ref, o_ref):
    # x_ref : [tn, in_dim]      (natural row-major layout of the input)
    # w1_ref: [hidden, in_dim], b1_ref: [hidden, 1]
    # w2_ref: [out_dim, hidden], b2_ref: [out_dim, 1]
    # o_ref : [out_dim, tn]     (lane-dense output, batch on lanes)
    x = x_ref[...]

    # Layer 1: contract x's last (in_dim) dim against W1's last dim on the MXU,
    # producing [hidden, tn] so the batch lands on the lane axis. f32 accum,
    # bias + ReLU on the VPU in f32.
    h = lax.dot_general(
        w1_ref[...], x,
        dimension_numbers=(((1,), (1,)), ((), ())),
        preferred_element_type=jnp.float32,
    ) + b1_ref[...]
    h = jnp.maximum(h, 0.0)          # ReLU
    # Dropout(p) in eval mode == identity.

    # Layer 2: cast activations back to the matmul dtype (no-op for f32).
    y = jnp.dot(w2_ref[...], h.astype(w2_ref.dtype),
                preferred_element_type=jnp.float32)
    y = y + b2_ref[...]
    o_ref[...] = y.astype(o_ref.dtype)


def attribute_decoder_forward(x, w1, b1, w2, b2, *, tn_max=2048,
                              compute_dtype=None):
    """Eval-mode AttributeDecoder forward.

    x : [N, in_dim]
    w1: [hidden, in_dim]   (PyTorch nn.Linear weight layout)
    b1: [hidden]
    w2: [out_dim, hidden]
    b2: [out_dim]
    returns [N, out_dim]
    """
    N, in_dim = x.shape
    hidden = w1.shape[0]
    out_dim = w2.shape[0]
    out_dtype = x.dtype

    # Output lane axis padded to a multiple of 128 only (NOT to a multiple of
    # tn). The input x itself is left untouched: the last grid step may read a
    # ragged block; the corresponding junk output columns are sliced off below.
    n_pad = int(_round_up(N, 128))

    # Big lane tiles amortize the ~0.35us per-grid-step fixed cost; aim for
    # >=2 grid steps when the batch is large enough so both v7x TensorCores
    # get work (dimension_semantics=("parallel",)).
    tn = int(min(tn_max, _round_up(pl.cdiv(n_pad, 2), 128)))
    grid = (int(pl.cdiv(n_pad, tn)),)

    if compute_dtype is not None:
        # Fallback cast path; prefer feeding bf16 activations/weights directly.
        xm = x.astype(compute_dtype)
        w1m = w1.astype(compute_dtype)
        w2m = w2.astype(compute_dtype)
    else:
        xm, w1m, w2m = x, w1, w2

    # Biases as f32 column vectors (broadcast across the lane/batch axis).
    b1c = b1.reshape(hidden, 1).astype(jnp.float32)
    b2c = b2.reshape(out_dim, 1).astype(jnp.float32)

    flops = 2 * n_pad * (in_dim * hidden + hidden * out_dim)
    bytes_accessed = (
        xm.size * xm.dtype.itemsize
        + w1m.size * w1m.dtype.itemsize
        + w2m.size * w2m.dtype.itemsize
        + b1c.size * 4 + b2c.size * 4
        + n_pad * out_dim * jnp.dtype(out_dtype).itemsize
    )

    yt = pl.pallas_call(
        _mlp_kernel,
        out_shape=jax.ShapeDtypeStruct((out_dim, n_pad), out_dtype),
        grid_spec=pl.GridSpec(
            grid=grid,
            in_specs=[
                # x tile in natural layout; ragged last block handled by Pallas.
                # (Buffered(3) only if a profile ever shows exposed input DMA.)
                pl.BlockSpec((tn, in_dim), lambda i: (i, 0)),
                pl.BlockSpec((hidden, in_dim), lambda i: (0, 0)),   # W1 resident
                pl.BlockSpec((hidden, 1), lambda i: (0, 0)),        # b1
                pl.BlockSpec((out_dim, hidden), lambda i: (0, 0)),  # W2 resident
                pl.BlockSpec((out_dim, 1), lambda i: (0, 0)),       # b2
            ],
            out_specs=pl.BlockSpec((out_dim, tn), lambda i: (0, i)),  # lane-dense
        ),
        compiler_params=pltpu.CompilerParams(
            dimension_semantics=("parallel",)),
        cost_estimate=pl.CostEstimate(
            flops=flops, transcendentals=0, bytes_accessed=bytes_accessed),
    )(xm, w1m, b1c, w2m, b2c)

    # Back to the module's [N, out_dim] layout; the transpose is paid on the
    # small (out_dim=16) output side, never on x.
    return yt[:, :N].T


def init_params(key, in_dim, hidden_dim, out_dim):
    """Deterministic init mimicking nn.Linear (uniform +/- 1/sqrt(fan_in)),
    weights in PyTorch [out_features, in_features] layout."""
    k1, k2, k3, k4 = jax.random.split(key, 4)
    lim1 = 1.0 / jnp.sqrt(in_dim)
    lim2 = 1.0 / jnp.sqrt(hidden_dim)
    w1 = jax.random.uniform(k1, (hidden_dim, in_dim), jnp.float32, -lim1, lim1)
    b1 = jax.random.uniform(k2, (hidden_dim,), jnp.float32, -lim1, lim1)
    w2 = jax.random.uniform(k3, (out_dim, hidden_dim), jnp.float32, -lim2, lim2)
    b2 = jax.random.uniform(k4, (out_dim,), jnp.float32, -lim2, lim2)
    return w1, b1, w2, b2


if __name__ == "__main__":
    # Shapes consistent with AttributeDecoder(in_dim=32, out_dim=16,
    # num_layers=2, hidden_dim=None -> hidden=in_dim=32); batch not a multiple
    # of 128 to exercise the ragged/padded-lane path.
    N, in_dim, hidden_dim, out_dim = 64, 32, 32, 16

    key = jax.random.PRNGKey(0)
    kx, kp = jax.random.split(key)
    x = jax.random.normal(kx, (N, in_dim), jnp.float32)
    w1, b1, w2, b2 = init_params(kp, in_dim, hidden_dim, out_dim)

    out = attribute_decoder_forward(x, w1, b1, w2, b2)
    out = jax.block_until_ready(out)

    # Pure-JAX reference (eval-mode forward, PyTorch weight layout).
    # NOTE: with compute_dtype=jnp.bfloat16 these tolerances must be loosened.
    ref = jnp.maximum(x @ w1.T + b1, 0.0) @ w2.T + b2
    assert out.shape == (N, out_dim)
    assert jnp.allclose(out, ref, atol=1e-5, rtol=1e-5)

    print("KERNEL_OK")
</pallas_src>

<mosaic_0001>
module attributes {stable_mosaic.version = 11 : i64} {
  func.func @_mlp_kernel(%arg0: i32, %arg1: memref<128x32xf32, #tpu.memory_space<vmem>>, %arg2: memref<32x32xf32, #tpu.memory_space<vmem>>, %arg3: memref<32x1xf32, #tpu.memory_space<vmem>>, %arg4: memref<16x32xf32, #tpu.memory_space<vmem>>, %arg5: memref<16x1xf32, #tpu.memory_space<vmem>>, %arg6: memref<16x128xf32, #tpu.memory_space<vmem>>) attributes {dimension_semantics = [#tpu.dimension_semantics<parallel>], iteration_bounds = array<i64: 1>, scalar_prefetch = 0 : i64, scratch_operands = 0 : i64, tpu.core_type = #tpu.core_type<tc>, window_params = [{transform_indices = @transform_0, window_bounds = array<i64: 128, 32>}, {pipeline_mode = #tpu.pipeline_mode<synchronous>, transform_indices = @transform_1, window_bounds = array<i64: 32, 32>}, {pipeline_mode = #tpu.pipeline_mode<synchronous>, transform_indices = @transform_2, window_bounds = array<i64: 32, 1>}, {pipeline_mode = #tpu.pipeline_mode<synchronous>, transform_indices = @transform_3, window_bounds = array<i64: 16, 32>}, {pipeline_mode = #tpu.pipeline_mode<synchronous>, transform_indices = @transform_4, window_bounds = array<i64: 16, 1>}, {transform_indices = @transform_5, window_bounds = array<i64: 16, 128>}]} {
    %c0 = arith.constant 0 : index
    %c0_0 = arith.constant 0 : index
    %0 = vector.load %arg1[%c0, %c0_0] : memref<128x32xf32, #tpu.memory_space<vmem>>, vector<128x32xf32>
    %c0_1 = arith.constant 0 : index
    %c0_2 = arith.constant 0 : index
    %1 = vector.load %arg2[%c0_1, %c0_2] : memref<32x32xf32, #tpu.memory_space<vmem>>, vector<32x32xf32>
    %cst = arith.constant dense<0.000000e+00> : vector<32x128xf32>
    %2 = tpu.matmul %1, %0, %cst {dimension_numbers = #tpu.dot_dimension_numbers<[1], [1], [0], [0], [0, 0, 1, 0], [], []>} : vector<32x32xf32>, vector<128x32xf32>, vector<32x128xf32> -> vector<32x128xf32>
    %c0_3 = arith.constant 0 : index
    %c0_4 = arith.constant 0 : index
    %3 = vector.load %arg3[%c0_3, %c0_4] : memref<32x1xf32, #tpu.memory_space<vmem>>, vector<32x1xf32>
    %4 = vector.broadcast %3 : vector<32x1xf32> to vector<32x128xf32>
    %5 = arith.addf %2, %4 : vector<32x128xf32>
    %cst_5 = arith.constant 0.000000e+00 : f32
    %6 = vector.broadcast %cst_5 : f32 to vector<32x128xf32>
    %7 = arith.maximumf %5, %6 : vector<32x128xf32>
    %c0_6 = arith.constant 0 : index
    %c0_7 = arith.constant 0 : index
    %8 = vector.load %arg4[%c0_6, %c0_7] : memref<16x32xf32, #tpu.memory_space<vmem>>, vector<16x32xf32>
    %cst_8 = arith.constant dense<0.000000e+00> : vector<16x128xf32>
    %9 = tpu.matmul %8, %7, %cst_8 {dimension_numbers = #tpu.dot_dimension_numbers<[1], [0], [0], [1], [0, 0, 1, 1], [], []>} : vector<16x32xf32>, vector<32x128xf32>, vector<16x128xf32> -> vector<16x128xf32>
    %c0_9 = arith.constant 0 : index
    %c0_10 = arith.constant 0 : index
    %10 = vector.load %arg5[%c0_9, %c0_10] : memref<16x1xf32, #tpu.memory_space<vmem>>, vector<16x1xf32>
    %11 = vector.broadcast %10 : vector<16x1xf32> to vector<16x128xf32>
    %12 = arith.addf %9, %11 : vector<16x128xf32>
    %c0_11 = arith.constant 0 : index
    %c0_12 = arith.constant 0 : index
    %13 = vector.load %arg6[%c0_11, %c0_12] : memref<16x128xf32, #tpu.memory_space<vmem>>, vector<16x128xf32>
    tpu.vector_store %arg6[%c0_11, %c0_12], %12 {strides = array<i32>} : memref<16x128xf32, #tpu.memory_space<vmem>>, vector<16x128xf32>,
    return
  }
  func.func @transform_0(%arg0: i32) -> (i32, i32) {
    %c0_i32 = arith.constant 0 : i32
    %c0_i32_0 = arith.constant 0 : i32
    return %arg0, %c0_i32 : i32, i32
  }
  func.func @transform_1(%arg0: i32) -> (i32, i32) {
    %c0_i32 = arith.constant 0 : i32
    %c0_i32_0 = arith.constant 0 : i32
    %c0_i32_1 = arith.constant 0 : i32
    return %c0_i32, %c0_i32_0 : i32, i32
  }
  func.func @transform_2(%arg0: i32) -> (i32, i32) {
    %c0_i32 = arith.constant 0 : i32
    %c0_i32_0 = arith.constant 0 : i32
    %c0_i32_1 = arith.constant 0 : i32
    return %c0_i32, %c0_i32_0 : i32, i32
  }
  func.func @transform_3(%arg0: i32) -> (i32, i32) {
    %c0_i32 = arith.constant 0 : i32
    %c0_i32_0 = arith.constant 0 : i32
    %c0_i32_1 = arith.constant 0 : i32
    return %c0_i32, %c0_i32_0 : i32, i32
  }
  func.func @transform_4(%arg0: i32) -> (i32, i32) {
    %c0_i32 = arith.constant 0 : i32
    %c0_i32_0 = arith.constant 0 : i32
    %c0_i32_1 = arith.constant 0 : i32
    return %c0_i32, %c0_i32_0 : i32, i32
  }
  func.func @transform_5(%arg0: i32) -> (i32, i32) {
    %c0_i32 = arith.constant 0 : i32
    %c0_i32_0 = arith.constant 0 : i32
    return %c0_i32, %arg0 : i32, i32
  }
}

</mosaic_0001>

<bundles_post_ra>
// kernel: tpu_custom_call.1
= control target key start
LH: loop header
LB: loop body
LE: loop exit
PB: predicated region body
PF: predicated region fallthrough
CT: control target
= control target key end

     0   :  { %vm65_vm0 = vcmask 261120   ;;  %v511_v6 = vmov 0   ;;  %s685_s0 = inlined_call_operand.vmem [shape: f32[64,32], index: 0, kind: input, shape index: {}]   ;;  %s686_s1 = inlined_call_operand.vmem [shape: f32[32,32], index: 1, kind: input, shape index: {}]   ;;  %s687_s2 = inlined_call_operand.vmem [shape: f32[32,1], index: 2, kind: input, shape index: {}]   ;;  %s688_s3 = inlined_call_operand.vmem [shape: f32[16,32], index: 3, kind: input, shape index: {}]   ;;  %s689_s4 = inlined_call_operand.vmem [shape: f32[16,1], index: 4, kind: input, shape index: {}]   ;;  %s690_s5 = inlined_call_operand.hbm [shape: f32[16,128], index: 5, kind: output, shape index: {}]  }
   0x1   :  { %v21_v0 = vld [vmem:[%s685_s0] sm:$0xff]  ;;  %v22_v1 = vld [vmem:[%s685_s0 + $0x8] sm:$0xff]  ;;  %v23_v2 = vld [vmem:[%s685_s0 + $0x10] sm:$0xff]  ;;  %485 = vset.pattern.permute.xlu0 %v511_v6  ;;  %486 = vset.pattern.permute.xlu1 %v511_v6 }
   0x2   :  { %v425_v3 = vpack.c.bf16 %v22_v1, %v21_v0  ;;  %vm556_vm1 = vmpackc.low %vm65_vm0, %vm65_vm0  ;;  %v24_v5 = vld [vmem:[%s685_s0 + $0x18] sm:$0xff]  ;;  %v37_v8 = vld [vmem:[%s686_s1] sm:$0xff] }
   0x3   :  { %v431_v7 = vpack.c.bf16 %v24_v5, %v23_v2  ;;  %v25_v9 = vld [vmem:[%s685_s0 + $0x20] sm:$0xff]  ;;  %v26_v10 = vld [vmem:[%s685_s0 + $0x28] sm:$0xff]  ;;  %408 = vmatprep.mubr.msk.f32.mxu0 %vm65_vm0, %v37_v8  ;;  %v43_v12 = vld [vmem:[%s687_s2 + $0x10] sm:$0xff] }
   0x4   :  { %427 = vmatprep.subr.msk.bf16.mxu0 %vm556_vm1, %v425_v3  ;;  %v41_v11 = vld [vmem:[%s687_s2] sm:$0xff]  ;;  %57 = vperm.xlu1 %486, %v43_v12   ;;  %v437_v13 = vpack.c.bf16 %v26_v10, %v25_v9  ;;  %v42_v14 = vld [vmem:[%s687_s2 + $0x8] sm:$0xff] }
   0x5   :  { %430 = vmatpush3.bf16.xpose.msk.msra.mxu0 %vm556_vm1, %v425_v3  ;;  %47 = vperm.xlu0 %485, %v41_v11  }
   0x6   :  { %433 = vmatprep.subr.msk.bf16.mxu0 %vm556_vm1, %v431_v7 }
   0x7   :  { %10 = vsyncpa [#allocation3], 0  ;;  %v44_v15 = vld [vmem:[%s687_s2 + $0x18] sm:$0xff]  ;;  %v217_v16 = vld [vmem:[%s689_s4] sm:$0xff]  ;;  %s512_s20 = smov [#allocation2]  }
   0x8   :  { %62 = vperm.xlu1 %486, %v44_v15   ;;  %v27_v17 = vld [vmem:[%s685_s0 + $0x30] sm:$0xff]  ;;  %v28_v18 = vld [vmem:[%s685_s0 + $0x38] sm:$0xff]  ;;  %v218_v19 = vld [vmem:[%s689_s4 + $0x8] sm:$0xff]  ;;  %s317_s2 = sshll.u32 %s512_s20, 4  ;;  %s318_s2 = int_to_ptr.vmem [resolvable:$true] %s317_s2 }
   0x9   :  { %52 = vperm.xlu0 %485, %v42_v14   ;;  %v443_v20 = vpack.c.bf16 %v28_v18, %v27_v17  ;;  %v29_v21 = vld [vmem:[%s685_s0 + $0x40] sm:$0xff]  ;;  %v30_v22 = vld [vmem:[%s685_s0 + $0x48] sm:$0xff]  ;;  %v31_v24 = vld [vmem:[%s685_s0 + $0x50] sm:$0xff]  ;;  %s487_s21 = scalar_lea.vmem %s318_s2, 256  ;;  %p492_p1 = scmp.lt.s32.totalorder %s318_s2, %s318_s2 }
   0xa   :  { %v449_v23 = vpack.c.bf16 %v30_v22, %v29_v21  ;;  %v32_v25 = vld [vmem:[%s685_s0 + $0x58] sm:$0xff]  ;;  %v33_v27 = vld [vmem:[%s685_s0 + $0x60] sm:$0xff]  ;;  %v34_v28 = vld [vmem:[%s685_s0 + $0x68] sm:$0xff]  ;;  %p488_p0 = scmp.ne.s32.totalorder %s318_s2, %s487_s21  ;;  %p493_p2 = scmp.lt.s32.totalorder %s487_s21, %s487_s21 }
   0xb   :  { %v455_v26 = vpack.c.bf16 %v32_v25, %v31_v24  ;;  %v461_v29 = vpack.c.bf16 %v34_v28, %v33_v27  ;;  %v35_v30 = vld [vmem:[%s685_s0 + $0x70] sm:$0xff]  ;;  %v36_v31 = vld [vmem:[%s685_s0 + $0x78] sm:$0xff]  ;;  %v38_v33 = vld [vmem:[%s686_s1 + $0x8] sm:$0xff] }
   0xc   :  { %226 = vperm.xlu1 %486, %v218_v19   ;;  %v467_v32 = vpack.c.bf16 %v36_v31, %v35_v30  ;;  %v39_v34 = vld [vmem:[%s686_s1 + $0x10] sm:$0xff]  ;;  %v40_v35 = vld [vmem:[%s686_s1 + $0x18] sm:$0xff]  ;;  %v215_v36 = vld [vmem:[%s688_s3] sm:$0xff]  ;;  %p494_p3 = por %p493_p2, %p492_p1 }
   0xd   :  { %436 = vmatpush3.bf16.xpose.msk.msra.mxu0 %vm556_vm1, %v431_v7  ;;  %221 = vperm.xlu0 %485, %v217_v16   ;;  %v216_v55 = vld [vmem:[%s688_s3 + $0x8] sm:$0xff] }
   0xe   :  { %439 = vmatprep.subr.msk.bf16.mxu0 %vm556_vm1, %v437_v13  ;;  %422 = vmatprep.mubr.msk.f32.mxu1 %vm65_vm0, %v215_v36  ;;  %p495_p4 = pnand %p494_p3, %p488_p0 }
  0x15   :  { %442 = vmatpush3.bf16.xpose.msk.msra.mxu0 %vm556_vm1, %v437_v13 }
  0x16   :  { %445 = vmatprep.subr.msk.bf16.mxu0 %vm556_vm1, %v443_v20 }
  0x1d   :  { %448 = vmatpush3.bf16.xpose.msk.msra.mxu0 %vm556_vm1, %v443_v20 }
  0x1e   :  { %451 = vmatprep.subr.msk.bf16.mxu0 %vm556_vm1, %v449_v23 }
  0x25   :  { %454 = vmatpush3.bf16.xpose.msk.msra.mxu0 %vm556_vm1, %v449_v23 }
  0x26   :  { %457 = vmatprep.subr.msk.bf16.mxu0 %vm556_vm1, %v455_v26 }
  0x2d   :  { %460 = vmatpush3.bf16.xpose.msk.msra.mxu0 %vm556_vm1, %v455_v26 }
  0x2e   :  { %463 = vmatprep.subr.msk.bf16.mxu0 %vm556_vm1, %v461_v29 }
  0x35   :  { %466 = vmatpush3.bf16.xpose.msk.msra.mxu0 %vm556_vm1, %v461_v29 }
  0x36   :  { %469 = vmatprep.subr.msk.bf16.mxu0 %vm556_vm1, %v467_v32 }
  0x3d   :  { %472 = vmatpush3.bf16.xpose.msk.msra.mxu0 %vm556_vm1, %v467_v32 }
  0x44   :  { %409 = vmatmul.mubr.msk.f32.vlgmr.msra.gmra.mrb[0].mxu0 %vm65_vm0, %v38_v33 }
  0x45   :  { %411 = vmatprep.mubr.msk.f32.mxu0 %vm65_vm0, %v39_v34 }
  0x48   :  { %412 = vmatmul.mubr.msk.f32.gmra.mrb[2].mxu0 %vm65_vm0, %v40_v35 }
  0x83   :  { %v58_v38 = vpop.permute.xlu1 %57 }
  0x84   :  { %v48_v37 = vpop.permute.xlu0 %47 }
  0x87   :  { %v63_v45 = vpop.permute.xlu1 %62 }
  0x88   :  { %v53_v39 = vpop.permute.xlu0 %52 }
  0x8b   :  { %v227_v56 = vpop.permute.xlu1 %226 }
  0x8c   :  { %v222_v58 = vpop.permute.xlu0 %221 }
 0x117   :  { %v410_v40 = vpop.f32.mrb[0].mxu0 }
 0x118   :  { %v198_v41 = vadd.f32 %v410_v40, %v53_v39  ;;  %v192_v42 = vpop.f32.mrb[1].mxu0 }
 0x119   :  { %v193_v43 = vadd.f32 %v192_v42, %v48_v37 }
 0x11a   :  { %v212_v44 = vmax.f32 %v198_v41, 0.0 }
 0x11b   :  { %v211_v46 = vmax.f32 %v193_v43, 0.0  ;;  %v413_v47 = vpop.f32.mrb[2].mxu0 }
 0x11c   :  { %v208_v48 = vadd.f32 %v413_v47, %v63_v45  ;;  %v202_v49 = vpop.f32.mrb[3].mxu0 }
 0x11d   :  { %v203_v50 = vadd.f32 %v202_v49, %v58_v38  ;;  %v473_v51 = vpack.c.bf16 %v212_v44, %v211_v46 }
 0x11e   :  { %v214_v52 = vmax.f32 %v208_v48, 0.0 }
 0x11f   :  { %v213_v53 = vmax.f32 %v203_v50, 0.0  ;;  %474 = vmatprep.subr.bf16.mxu1 %v473_v51 }
 0x120   :  { %476 = vmatpush3.bf16.msra.mxu1 %v473_v51 }
 0x121   :  { %v477_v54 = vpack.c.bf16 %v214_v52, %v213_v53 }
 0x123   :  { %478 = vmatprep.subr.bf16.mxu1 %v477_v54 }
 0x124   :  { %480 = vmatpush3.bf16.msra.mxu1 %v477_v54 }
 0x127   :  { %423 = vmatmul.mubr.msk.f32.vlgmr.msra.gmra.mrb[0].mxu1 %vm65_vm0, %v216_v55 }
 0x1fa   :  { %v424_v57 = vpop.f32.mrb[0].mxu1 }
 0x1fb   :  { %v307_v59 = vadd.f32 %v424_v57, %v227_v56  ;;  %v301_v60 = vpop.f32.mrb[1].mxu1 }
 0x1fc   :  { %v302_v61 = vadd.f32 %v301_v60, %v222_v58 }
 0x1fd   :  { %311 = vst [vmem:[#allocation2 + $0x8] sm:$0xff] %v307_v59 }
 0x1fe   :  { %310 = vst [vmem:[#allocation2] sm:$0xff] %v302_v61 }
 0x1ff   :  { %498 = shalt.err (!%p495_p4)
}
 0x200   :  { %s499_s23 = scalar_lea.hbm %s690_s5, 256 }
 0x201   :  { %p500_p5 = scmp.ne.s32.totalorder %s690_s5, %s499_s23  ;;  %p503_p6 = scmp.lt.u32.totalorder %s499_s23, %s690_s5 }
 0x203   :  { %p505_p7 = pnand %p503_p6, %p500_p5 }
 0x205   :  { %508 = shalt.err (!%p505_p7)
}
 0x206   :  { %s513_s27 = smov 128   ;;  %s514_s28 = smov 8  }
 0x207   :  { %323 = dma.vmem_to_hbm [thread:$0]  %s318_s2, 256, %s690_s5, [#allocation3], %s513_s27, %s513_s27, %s514_s28  }
 0x208   :  { %509 = dma.done.wait [#allocation3], 256  }
 0x209   :  { %510 = vsyncadd [#allocation3], 4294967040 }
 0x20a   :  { %327 = vsyncpa [#allocation3], 1 }

</bundles_post_ra>
